<compile_context>
chip_gen: v5e
topology: v5e:2x2
jax: 0.10.0
libtpu: 0.0.40
codegen_flags: <defaults>
</compile_context>

<pallas_src>
import math

import jax
import jax.numpy as jnp
import numpy as np
from jax.experimental import pallas as pl
from jax.experimental.pallas import tpu as pltpu


_CONV_SPECS = [  # (Cout, Cin, kh, kw, stride, pad)
    (8, 2, 5, 5, 2, 2),
    (16, 8, 3, 3, 2, 1),
    (32, 16, 3, 3, 2, 1),
    (64, 32, 3, 3, 2, 1),
]
_BN_EPS = 1e-5


def _cdiv(a, b):
    return -(-a // b)


# ------------------------------ static geometry ------------------------------

def _layer_geometry(h, w):
    geo = []
    for (co, ci, kh, kw, s, p) in _CONV_SPECS:
        hp, wp = h + 2 * p, w + 2 * p
        ho = (hp - kh) // s + 1
        wo = (wp - kw) // s + 1
        # Static validity checks (review: guard against silent OOB / empty output).
        assert ho >= 1 and wo >= 1, "input spatially too small for the conv stack"
        assert s * (ho - 1) + kh <= hp and s * (wo - 1) + kw <= wp
        geo.append(dict(cin=ci, cout=co, kh=kh, kw=kw, s=s, p=p,
                        h=h, w=w, hp=hp, wp=wp, ho=ho, wo=wo,
                        lin=w * ci, lout=wo * co))
        h, w = ho, wo
    return geo


# ------------------------------ host-side packing ----------------------------

def _lower_conv_weight(w_oihw, g):
    """Re-pack an OIHW conv weight into kh 'lowered' row-GEMM matrices.

    wl[i, w*Cin + ci, wo*Cout + co] = w[co, ci, i, (s*wo + j) == w + pad ...]
    i.e. one padded input row-block [Ho, W*Cin] (rows s*ho+i) times wl[i] gives
    the layer's contribution of kernel-row i to [Ho, Wo*Cout].  Taps that fall
    in the left/right zero padding are simply omitted (they contribute 0), so
    activations only need row (H) padding, never lane (W) padding.
    """
    co, ci = g["cout"], g["cin"]
    kh, kw, s, p = g["kh"], g["kw"], g["s"], g["p"]
    w_in, wo = g["w"], g["wo"]
    w = np.asarray(w_oihw, np.float32)
    wl = np.zeros((kh, w_in * ci, wo * co), np.float32)
    for i in range(kh):
        for j in range(kw):
            blk = w[:, :, i, j].T                       # [Cin, Cout]
            for o in range(wo):
                wcol = s * o + j - p                    # unpadded input column
                if 0 <= wcol < w_in:
                    wl[i, wcol * ci:(wcol + 1) * ci, o * co:(o + 1) * co] = blk
    return wl


def _epilogue_rows(prm, g):
    """bias / BN(eval) scale / shift tiled to the [Wo*Cout] output-row layout."""
    wo = g["wo"]
    scale = np.asarray(prm["gamma"], np.float32) / np.sqrt(
        np.asarray(prm["rvar"], np.float32) + _BN_EPS)
    shift = np.asarray(prm["beta"], np.float32) - np.asarray(prm["rmean"], np.float32) * scale
    bias = np.asarray(prm["b"], np.float32)
    return np.stack([np.tile(bias, wo), np.tile(scale, wo), np.tile(shift, wo)], axis=0)


def _resident_spec(shape):
    # Same block every grid step -> loaded once, stays VMEM-resident.
    return pl.BlockSpec(tuple(shape), lambda gi, _n=len(shape): (0,) * _n)


# ------------------------------ fused kernel ---------------------------------

def _make_kernel(geo, bb, compute_dtype):
    n_layers = len(geo)
    cd = jnp.dtype(compute_dtype)
    cast = cd != jnp.dtype(jnp.float32)

    def kernel(*refs):
        x_ref = refs[0]                                        # [bb, Hp1, W1*Cin1]
        wl_refs = [refs[1 + 2 * l] for l in range(n_layers)]   # [kh, W*Cin, Wo*Cout]
        ep_refs = [refs[2 + 2 * l] for l in range(n_layers)]   # [3, Wo*Cout]
        head_ref = refs[1 + 2 * n_layers]                      # [Wo4*Cout4, nb_pad]
        lb_ref = refs[2 + 2 * n_layers]                        # [1, nb_pad]
        out_ref = refs[3 + 2 * n_layers]                       # [bb, 1, nb_pad]
        act_refs = list(refs[4 + 2 * n_layers:4 + 3 * n_layers])  # per-layer inputs
        pool_ref = refs[4 + 3 * n_layers]                      # [bb, Wo4*Cout4]

        # Activation buffers of layers 2..4 need a zero row-halo.  Re-zero every
        # step (only a handful of vregs); a program_id==0 guard would be unsafe
        # under a "parallel" grid split across v7x TensorCores.
        for l in range(1, n_layers):
            act_refs[l][...] = jnp.zeros(act_refs[l].shape, jnp.float32)

        # Layer-1 input: copy the already row-padded HBM block into the flat
        # 2-D activation scratch so every later access is a plain 2-D VMEM read.
        hp1 = geo[0]["hp"]
        for b in range(bb):
            act_refs[0][b * hp1:(b + 1) * hp1, :] = x_ref[b]

        for l, g in enumerate(geo):
            kh, s = g["kh"], g["s"]
            hp, ho, lout = g["hp"], g["ho"], g["lout"]
            src = act_refs[l]
            last = l == n_layers - 1
            if not last:
                gn = geo[l + 1]
                pn, hpn = gn["p"], gn["hp"]
                dst = act_refs[l + 1]

            # Hoisted epilogue broadcasts (once per layer per step, not per sample).
            bias_f = jnp.broadcast_to(ep_refs[l][0:1, :], (ho, lout))
            scale_f = jnp.broadcast_to(ep_refs[l][1:2, :], (ho, lout))
            shift_f = jnp.broadcast_to(ep_refs[l][2:3, :], (ho, lout))

            for b in range(bb):
                acc = None
                for i in range(kh):
                    r0 = b * hp + i
                    if ho == 1 or s == 1:
                        lhs = src[pl.ds(r0, ho), :]
                    else:
                        lhs = src[pl.ds(r0, ho, s), :]         # rows r0, r0+s, ...
                    if cast:
                        lhs = lhs.astype(cd)
                    part = jnp.dot(lhs, wl_refs[l][i],
                                   preferred_element_type=jnp.float32)
                    acc = part if acc is None else acc + part
                # conv bias -> ReLU -> BatchNorm(eval), all f32.   [Ho, Wo*Cout]
                row = jnp.maximum(acc + bias_f, 0.0) * scale_f + shift_f
                if not last:
                    rb = b * hpn + pn
                    dst[pl.ds(rb, ho), :] = row                # full-lane store
                else:
                    pool_ref[b:b + 1, :] = jnp.sum(row, axis=0, keepdims=True)

        # AdaptiveAvgPool2d(1) + Linear head: one lane-dense [bb, nb_pad] matmul.
        logits = jnp.dot(pool_ref[...], head_ref[...],
                         preferred_element_type=jnp.float32) + lb_ref[...]
        out_ref[:, 0, :] = logits

    return kernel


# ------------------------------ forward wrapper ------------------------------

def audio_classifier_forward(x_nchw, conv_params, lin_w, lin_b, *,
                             batch_block=32, compute_dtype=jnp.float32):
    """AudioClassifier forward.  x_nchw: [N, 2, H, W] float32 (PyTorch layout)."""
    n, cin0, h, w = x_nchw.shape
    assert cin0 == _CONV_SPECS[0][1]
    geo = _layer_geometry(h, w)
    nb = lin_w.shape[0]
    nb_pad = _cdiv(nb, 128) * 128

    # Batch blocking: bb samples per grid step; keep >= 2 steps when N > 1 so a
    # v7x megacore "parallel" split has work for both TensorCores.
    bb = max(1, min(batch_block, n))
    while n > 1 and _cdiv(n, bb) < 2 and bb > 1:
        bb = _cdiv(bb, 2)
    grid_n = _cdiv(n, bb)
    n_pad = grid_n * bb

    g0 = geo[0]
    p0, hp1, lin1 = g0["p"], g0["hp"], g0["lin"]

    # Host glue: NCHW -> NHWC, zero-pad H (rows) only, fold (W, C) onto the lane
    # axis -> [N_pad, Hp1, W*Cin].  W padding is absorbed into the lowered
    # weights, so the only HBM->VMEM DMA per step is bb compact image blocks.
    xc = jnp.transpose(x_nchw.astype(jnp.float32), (0, 2, 3, 1))
    xc = jnp.pad(xc, ((0, n_pad - n), (p0, p0), (0, 0), (0, 0)))
    xr = xc.reshape(n_pad, hp1, lin1)

    operands = [xr]
    in_specs = [pl.BlockSpec((bb, hp1, lin1), lambda gi: (gi, 0, 0))]

    flops = 0
    for prm, g in zip(conv_params, geo):
        wl = jnp.asarray(_lower_conv_weight(prm["w"], g)).astype(compute_dtype)
        epi = jnp.asarray(_epilogue_rows(prm, g))          # epilogue stays f32
        operands += [wl, epi]
        in_specs += [_resident_spec(wl.shape), _resident_spec(epi.shape)]
        flops += 2 * n_pad * g["ho"] * g["wo"] * g["kh"] * g["kw"] * g["cin"] * g["cout"]

    gl = geo[-1]
    # Fold AdaptiveAvgPool2d(1) + Linear into one [Wo4*Cout4, nb_pad] matrix.
    head = np.tile(np.asarray(lin_w, np.float32).T / float(gl["ho"] * gl["wo"]),
                   (gl["wo"], 1))
    head_pad = np.zeros((gl["lout"], nb_pad), np.float32)
    head_pad[:, :nb] = head
    lb_pad = np.zeros((1, nb_pad), np.float32)
    lb_pad[0, :nb] = np.asarray(lin_b, np.float32)
    operands += [jnp.asarray(head_pad), jnp.asarray(lb_pad)]
    in_specs += [_resident_spec(head_pad.shape), _resident_spec(lb_pad.shape)]
    flops += 2 * n_pad * gl["cout"] * nb

    # Inter-layer activations live only in 2-D VMEM scratch (rows = b*Hp + h).
    scratch_shapes = [pltpu.VMEM((bb * g["hp"], g["lin"]), jnp.float32) for g in geo]
    scratch_shapes += [pltpu.VMEM((bb, gl["lout"]), jnp.float32)]

    bytes_accessed = (int(xr.size) * 4
                      + sum(int(o.size) * o.dtype.itemsize for o in operands[1:])
                      + n_pad * nb_pad * 4)

    out = pl.pallas_call(
        _make_kernel(geo, bb, compute_dtype),
        out_shape=jax.ShapeDtypeStruct((n_pad, 1, nb_pad), jnp.float32),
        grid_spec=pltpu.PrefetchScalarGridSpec(
            num_scalar_prefetch=0,
            grid=(grid_n,),
            in_specs=in_specs,
            out_specs=pl.BlockSpec((bb, 1, nb_pad), lambda gi: (gi, 0, 0)),
            scratch_shapes=scratch_shapes,
        ),
        compiler_params=pltpu.CompilerParams(
            dimension_semantics=("parallel",),
            # Headroom note: at bb=32 this kernel uses well under 4 MiB of VMEM
            # (packed params ~0.4 MiB x double buffer, activations ~30 KiB per
            # sample); 32 MiB fits v7x's 64 MiB/core and v5e/v6e's 128 MiB.
            vmem_limit_bytes=32 * 1024 * 1024,
        ),
        cost_estimate=pl.CostEstimate(flops=int(flops), transcendentals=0,
                                      bytes_accessed=int(bytes_accessed)),
    )(*operands)
    return out.reshape(n_pad, nb_pad)[:n, :nb]


# ------------------------------ params & reference ---------------------------

def init_params(key, nb_classes):
    a = 0.1
    conv_params = []
    for (co, ci, kh, kw, _, _) in _CONV_SPECS:
        key, sub = jax.random.split(key)
        fan_in = ci * kh * kw
        std = math.sqrt(2.0 / (1.0 + a * a)) / math.sqrt(fan_in)  # kaiming_normal_(a=0.1)
        conv_params.append(dict(
            w=std * jax.random.normal(sub, (co, ci, kh, kw), jnp.float32),
            b=jnp.zeros((co,), jnp.float32),
            gamma=jnp.ones((co,), jnp.float32),
            beta=jnp.zeros((co,), jnp.float32),
            rmean=jnp.zeros((co,), jnp.float32),
            rvar=jnp.ones((co,), jnp.float32),
        ))
    key, k1, k2 = jax.random.split(key, 3)
    bound = 1.0 / math.sqrt(64.0)
    lin_w = jax.random.uniform(k1, (nb_classes, 64), jnp.float32, -bound, bound)
    lin_b = jax.random.uniform(k2, (nb_classes,), jnp.float32, -bound, bound)
    return conv_params, lin_w, lin_b


def reference_forward(x, conv_params, lin_w, lin_b, eps=_BN_EPS):
    for prm, (co, ci, kh, kw, s, p) in zip(conv_params, _CONV_SPECS):
        x = jax.lax.conv_general_dilated(
            x, prm["w"], window_strides=(s, s), padding=[(p, p), (p, p)],
            dimension_numbers=("NCHW", "OIHW", "NCHW"))
        x = x + prm["b"][None, :, None, None]
        x = jnp.maximum(x, 0.0)
        scale = prm["gamma"] / jnp.sqrt(prm["rvar"] + eps)
        shift = prm["beta"] - prm["rmean"] * scale
        x = x * scale[None, :, None, None] + shift[None, :, None, None]
    pooled = jnp.mean(x, axis=(2, 3))
    return pooled @ lin_w.T + lin_b


# ----------------------------------- main ------------------------------------

if __name__ == "__main__":
    nb_classes = 10
    key = jax.random.PRNGKey(0)
    key, xkey = jax.random.split(key)
    x = jax.random.normal(xkey, (2, 2, 16, 16), jnp.float32)   # NCHW, Cin=2

    conv_params, lin_w, lin_b = init_params(key, nb_classes)

    out = audio_classifier_forward(x, conv_params, lin_w, lin_b)
    out = jax.block_until_ready(out)

    ref = reference_forward(x, conv_params, lin_w, lin_b)
    assert out.shape == (2, nb_classes)
    assert jnp.allclose(out, ref, atol=1e-4, rtol=1e-4), "mismatch vs reference"

    print("KERNEL_OK")
</pallas_src>

<mosaic_0001>
module attributes {stable_mosaic.version = 11 : i64} {
  func.func @kernel(%arg0: i32, %arg1: memref<1x20x32xf32, #tpu.memory_space<vmem>>, %arg2: memref<5x32x64xf32, #tpu.memory_space<vmem>>, %arg3: memref<3x64xf32, #tpu.memory_space<vmem>>, %arg4: memref<3x64x64xf32, #tpu.memory_space<vmem>>, %arg5: memref<3x64xf32, #tpu.memory_space<vmem>>, %arg6: memref<3x64x64xf32, #tpu.memory_space<vmem>>, %arg7: memref<3x64xf32, #tpu.memory_space<vmem>>, %arg8: memref<3x64x64xf32, #tpu.memory_space<vmem>>, %arg9: memref<3x64xf32, #tpu.memory_space<vmem>>, %arg10: memref<64x128xf32, #tpu.memory_space<vmem>>, %arg11: memref<1x128xf32, #tpu.memory_space<vmem>>, %arg12: memref<1x1x128xf32, #tpu.memory_space<vmem>>, %arg13: memref<20x32xf32, #tpu.memory_space<vmem>>, %arg14: memref<10x64xf32, #tpu.memory_space<vmem>>, %arg15: memref<6x64xf32, #tpu.memory_space<vmem>>, %arg16: memref<4x64xf32, #tpu.memory_space<vmem>>, %arg17: memref<1x64xf32, #tpu.memory_space<vmem>>) attributes {dimension_semantics = [#tpu.dimension_semantics<parallel>], iteration_bounds = array<i64: 2>, scalar_prefetch = 0 : i64, scratch_operands = 5 : i64, tpu.core_type = #tpu.core_type<tc>, window_params = [{transform_indices = @transform_0, window_bounds = array<i64: 1, 20, 32>}, {pipeline_mode = #tpu.pipeline_mode<synchronous>, transform_indices = @transform_1, window_bounds = array<i64: 5, 32, 64>}, {pipeline_mode = #tpu.pipeline_mode<synchronous>, transform_indices = @transform_2, window_bounds = array<i64: 3, 64>}, {pipeline_mode = #tpu.pipeline_mode<synchronous>, transform_indices = @transform_3, window_bounds = array<i64: 3, 64, 64>}, {pipeline_mode = #tpu.pipeline_mode<synchronous>, transform_indices = @transform_4, window_bounds = array<i64: 3, 64>}, {pipeline_mode = #tpu.pipeline_mode<synchronous>, transform_indices = @transform_5, window_bounds = array<i64: 3, 64, 64>}, {pipeline_mode = #tpu.pipeline_mode<synchronous>, transform_indices = @transform_6, window_bounds = array<i64: 3, 64>}, {pipeline_mode = #tpu.pipeline_mode<synchronous>, transform_indices = @transform_7, window_bounds = array<i64: 3, 64, 64>}, {pipeline_mode = #tpu.pipeline_mode<synchronous>, transform_indices = @transform_8, window_bounds = array<i64: 3, 64>}, {pipeline_mode = #tpu.pipeline_mode<synchronous>, transform_indices = @transform_9, window_bounds = array<i64: 64, 128>}, {pipeline_mode = #tpu.pipeline_mode<synchronous>, transform_indices = @transform_10, window_bounds = array<i64: 1, 128>}, {transform_indices = @transform_11, window_bounds = array<i64: 1, 1, 128>}]} {
    %cst = arith.constant 0.000000e+00 : f32
    %0 = vector.broadcast %cst : f32 to vector<10x64xf32>
    %c0 = arith.constant 0 : index
    %c0_0 = arith.constant 0 : index
    %1 = vector.load %arg14[%c0, %c0_0] : memref<10x64xf32, #tpu.memory_space<vmem>>, vector<10x64xf32>
    tpu.vector_store %arg14[%c0, %c0_0], %0 {strides = array<i32>} : memref<10x64xf32, #tpu.memory_space<vmem>>, vector<10x64xf32>,
    %cst_1 = arith.constant 0.000000e+00 : f32
    %2 = vector.broadcast %cst_1 : f32 to vector<6x64xf32>
    %c0_2 = arith.constant 0 : index
    %c0_3 = arith.constant 0 : index
    %3 = vector.load %arg15[%c0_2, %c0_3] : memref<6x64xf32, #tpu.memory_space<vmem>>, vector<6x64xf32>
    tpu.vector_store %arg15[%c0_2, %c0_3], %2 {strides = array<i32>} : memref<6x64xf32, #tpu.memory_space<vmem>>, vector<6x64xf32>,
    %cst_4 = arith.constant 0.000000e+00 : f32
    %4 = vector.broadcast %cst_4 : f32 to vector<4x64xf32>
    %c0_5 = arith.constant 0 : index
    %c0_6 = arith.constant 0 : index
    %5 = vector.load %arg16[%c0_5, %c0_6] : memref<4x64xf32, #tpu.memory_space<vmem>>, vector<4x64xf32>
    tpu.vector_store %arg16[%c0_5, %c0_6], %4 {strides = array<i32>} : memref<4x64xf32, #tpu.memory_space<vmem>>, vector<4x64xf32>,
    %c0_7 = arith.constant 0 : index
    %c0_8 = arith.constant 0 : index
    %c0_9 = arith.constant 0 : index
    %6 = vector.load %arg1[%c0_7, %c0_8, %c0_9] : memref<1x20x32xf32, #tpu.memory_space<vmem>>, vector<1x20x32xf32>
    %7 = vector.shape_cast %6 : vector<1x20x32xf32> to vector<20x32xf32>
    %c0_10 = arith.constant 0 : index
    %c0_11 = arith.constant 0 : index
    %8 = vector.load %arg13[%c0_10, %c0_11] : memref<20x32xf32, #tpu.memory_space<vmem>>, vector<20x32xf32>
    tpu.vector_store %arg13[%c0_10, %c0_11], %7 {strides = array<i32>} : memref<20x32xf32, #tpu.memory_space<vmem>>, vector<20x32xf32>,
    %c0_12 = arith.constant 0 : index
    %c0_13 = arith.constant 0 : index
    %9 = vector.load %arg3[%c0_12, %c0_13] : memref<3x64xf32, #tpu.memory_space<vmem>>, vector<1x64xf32>
    %10 = vector.shape_cast %9 : vector<1x64xf32> to vector<1x64xf32>
    %11 = vector.broadcast %10 : vector<1x64xf32> to vector<8x64xf32>
    %c1 = arith.constant 1 : index
    %c0_14 = arith.constant 0 : index
    %12 = vector.load %arg3[%c1, %c0_14] : memref<3x64xf32, #tpu.memory_space<vmem>>, vector<1x64xf32>
    %13 = vector.shape_cast %12 : vector<1x64xf32> to vector<1x64xf32>
    %14 = vector.broadcast %13 : vector<1x64xf32> to vector<8x64xf32>
    %c2 = arith.constant 2 : index
    %c0_15 = arith.constant 0 : index
    %15 = vector.load %arg3[%c2, %c0_15] : memref<3x64xf32, #tpu.memory_space<vmem>>, vector<1x64xf32>
    %16 = vector.shape_cast %15 : vector<1x64xf32> to vector<1x64xf32>
    %17 = vector.broadcast %16 : vector<1x64xf32> to vector<8x64xf32>
    %c0_16 = arith.constant 0 : index
    %c0_17 = arith.constant 0 : index
    %18 = tpu.strided_load %arg13[%c0_16, %c0_17] {strides = array<i32: 2, 1>} : memref<20x32xf32, #tpu.memory_space<vmem>>, vector<8x32xf32>
    %c0_18 = arith.constant 0 : index
    %c0_19 = arith.constant 0 : index
    %c0_20 = arith.constant 0 : index
    %19 = vector.load %arg2[%c0_18, %c0_19, %c0_20] : memref<5x32x64xf32, #tpu.memory_space<vmem>>, vector<1x32x64xf32>
    %20 = vector.shape_cast %19 : vector<1x32x64xf32> to vector<32x64xf32>
    %cst_21 = arith.constant dense<0.000000e+00> : vector<8x64xf32>
    %21 = tpu.matmul %18, %20, %cst_21 {dimension_numbers = #tpu.dot_dimension_numbers<[1], [0], [0], [1], [0, 0, 1, 1], [], []>} : vector<8x32xf32>, vector<32x64xf32>, vector<8x64xf32> -> vector<8x64xf32>
    %c1_22 = arith.constant 1 : index
    %c0_23 = arith.constant 0 : index
    %22 = tpu.strided_load %arg13[%c1_22, %c0_23] {strides = array<i32: 2, 1>} : memref<20x32xf32, #tpu.memory_space<vmem>>, vector<8x32xf32>
    %c1_24 = arith.constant 1 : index
    %c0_25 = arith.constant 0 : index
    %c0_26 = arith.constant 0 : index
    %23 = vector.load %arg2[%c1_24, %c0_25, %c0_26] : memref<5x32x64xf32, #tpu.memory_space<vmem>>, vector<1x32x64xf32>
    %24 = vector.shape_cast %23 : vector<1x32x64xf32> to vector<32x64xf32>
    %cst_27 = arith.constant dense<0.000000e+00> : vector<8x64xf32>
    %25 = tpu.matmul %22, %24, %cst_27 {dimension_numbers = #tpu.dot_dimension_numbers<[1], [0], [0], [1], [0, 0, 1, 1], [], []>} : vector<8x32xf32>, vector<32x64xf32>, vector<8x64xf32> -> vector<8x64xf32>
    %26 = arith.addf %21, %25 : vector<8x64xf32>
    %c2_28 = arith.constant 2 : index
    %c0_29 = arith.constant 0 : index
    %27 = tpu.strided_load %arg13[%c2_28, %c0_29] {strides = array<i32: 2, 1>} : memref<20x32xf32, #tpu.memory_space<vmem>>, vector<8x32xf32>
    %c2_30 = arith.constant 2 : index
    %c0_31 = arith.constant 0 : index
    %c0_32 = arith.constant 0 : index
    %28 = vector.load %arg2[%c2_30, %c0_31, %c0_32] : memref<5x32x64xf32, #tpu.memory_space<vmem>>, vector<1x32x64xf32>
    %29 = vector.shape_cast %28 : vector<1x32x64xf32> to vector<32x64xf32>
    %cst_33 = arith.constant dense<0.000000e+00> : vector<8x64xf32>
    %30 = tpu.matmul %27, %29, %cst_33 {dimension_numbers = #tpu.dot_dimension_numbers<[1], [0], [0], [1], [0, 0, 1, 1], [], []>} : vector<8x32xf32>, vector<32x64xf32>, vector<8x64xf32> -> vector<8x64xf32>
    %31 = arith.addf %26, %30 : vector<8x64xf32>
    %c3 = arith.constant 3 : index
    %c0_34 = arith.constant 0 : index
    %32 = tpu.strided_load %arg13[%c3, %c0_34] {strides = array<i32: 2, 1>} : memref<20x32xf32, #tpu.memory_space<vmem>>, vector<8x32xf32>
    %c3_35 = arith.constant 3 : index
    %c0_36 = arith.constant 0 : index
    %c0_37 = arith.constant 0 : index
    %33 = vector.load %arg2[%c3_35, %c0_36, %c0_37] : memref<5x32x64xf32, #tpu.memory_space<vmem>>, vector<1x32x64xf32>
    %34 = vector.shape_cast %33 : vector<1x32x64xf32> to vector<32x64xf32>
    %cst_38 = arith.constant dense<0.000000e+00> : vector<8x64xf32>
    %35 = tpu.matmul %32, %34, %cst_38 {dimension_numbers = #tpu.dot_dimension_numbers<[1], [0], [0], [1], [0, 0, 1, 1], [], []>} : vector<8x32xf32>, vector<32x64xf32>, vector<8x64xf32> -> vector<8x64xf32>
    %36 = arith.addf %31, %35 : vector<8x64xf32>
    %c4 = arith.constant 4 : index
    %c0_39 = arith.constant 0 : index
    %37 = tpu.strided_load %arg13[%c4, %c0_39] {strides = array<i32: 2, 1>} : memref<20x32xf32, #tpu.memory_space<vmem>>, vector<8x32xf32>
    %c4_40 = arith.constant 4 : index
    %c0_41 = arith.constant 0 : index
    %c0_42 = arith.constant 0 : index
    %38 = vector.load %arg2[%c4_40, %c0_41, %c0_42] : memref<5x32x64xf32, #tpu.memory_space<vmem>>, vector<1x32x64xf32>
    %39 = vector.shape_cast %38 : vector<1x32x64xf32> to vector<32x64xf32>
    %cst_43 = arith.constant dense<0.000000e+00> : vector<8x64xf32>
    %40 = tpu.matmul %37, %39, %cst_43 {dimension_numbers = #tpu.dot_dimension_numbers<[1], [0], [0], [1], [0, 0, 1, 1], [], []>} : vector<8x32xf32>, vector<32x64xf32>, vector<8x64xf32> -> vector<8x64xf32>
    %41 = arith.addf %36, %40 : vector<8x64xf32>
    %42 = arith.addf %41, %11 : vector<8x64xf32>
    %cst_44 = arith.constant 0.000000e+00 : f32
    %43 = vector.broadcast %cst_44 : f32 to vector<8x64xf32>
    %44 = arith.maximumf %42, %43 : vector<8x64xf32>
    %45 = arith.mulf %44, %14 : vector<8x64xf32>
    %46 = arith.addf %45, %17 : vector<8x64xf32>
    %c1_45 = arith.constant 1 : index
    %c0_46 = arith.constant 0 : index
    %47 = vector.load %arg14[%c1_45, %c0_46] : memref<10x64xf32, #tpu.memory_space<vmem>>, vector<8x64xf32>
    tpu.vector_store %arg14[%c1_45, %c0_46], %46 {strides = array<i32>} : memref<10x64xf32, #tpu.memory_space<vmem>>, vector<8x64xf32>,
    %c0_47 = arith.constant 0 : index
    %c0_48 = arith.constant 0 : index
    %48 = vector.load %arg5[%c0_47, %c0_48] : memref<3x64xf32, #tpu.memory_space<vmem>>, vector<1x64xf32>
    %49 = vector.shape_cast %48 : vector<1x64xf32> to vector<1x64xf32>
    %50 = vector.broadcast %49 : vector<1x64xf32> to vector<4x64xf32>
    %c1_49 = arith.constant 1 : index
    %c0_50 = arith.constant 0 : index
    %51 = vector.load %arg5[%c1_49, %c0_50] : memref<3x64xf32, #tpu.memory_space<vmem>>, vector<1x64xf32>
    %52 = vector.shape_cast %51 : vector<1x64xf32> to vector<1x64xf32>
    %53 = vector.broadcast %52 : vector<1x64xf32> to vector<4x64xf32>
    %c2_51 = arith.constant 2 : index
    %c0_52 = arith.constant 0 : index
    %54 = vector.load %arg5[%c2_51, %c0_52] : memref<3x64xf32, #tpu.memory_space<vmem>>, vector<1x64xf32>
    %55 = vector.shape_cast %54 : vector<1x64xf32> to vector<1x64xf32>
    %56 = vector.broadcast %55 : vector<1x64xf32> to vector<4x64xf32>
    %c0_53 = arith.constant 0 : index
    %c0_54 = arith.constant 0 : index
    %57 = tpu.strided_load %arg14[%c0_53, %c0_54] {strides = array<i32: 2, 1>} : memref<10x64xf32, #tpu.memory_space<vmem>>, vector<4x64xf32>
    %c0_55 = arith.constant 0 : index
    %c0_56 = arith.constant 0 : index
    %c0_57 = arith.constant 0 : index
    %58 = vector.load %arg4[%c0_55, %c0_56, %c0_57] : memref<3x64x64xf32, #tpu.memory_space<vmem>>, vector<1x64x64xf32>
    %59 = vector.shape_cast %58 : vector<1x64x64xf32> to vector<64x64xf32>
    %cst_58 = arith.constant dense<0.000000e+00> : vector<4x64xf32>
    %60 = tpu.matmul %57, %59, %cst_58 {dimension_numbers = #tpu.dot_dimension_numbers<[1], [0], [0], [1], [0, 0, 1, 1], [], []>} : vector<4x64xf32>, vector<64x64xf32>, vector<4x64xf32> -> vector<4x64xf32>
    %c1_59 = arith.constant 1 : index
    %c0_60 = arith.constant 0 : index
    %61 = tpu.strided_load %arg14[%c1_59, %c0_60] {strides = array<i32: 2, 1>} : memref<10x64xf32, #tpu.memory_space<vmem>>, vector<4x64xf32>
    %c1_61 = arith.constant 1 : index
    %c0_62 = arith.constant 0 : index
    %c0_63 = arith.constant 0 : index
    %62 = vector.load %arg4[%c1_61, %c0_62, %c0_63] : memref<3x64x64xf32, #tpu.memory_space<vmem>>, vector<1x64x64xf32>
    %63 = vector.shape_cast %62 : vector<1x64x64xf32> to vector<64x64xf32>
    %cst_64 = arith.constant dense<0.000000e+00> : vector<4x64xf32>
    %64 = tpu.matmul %61, %63, %cst_64 {dimension_numbers = #tpu.dot_dimension_numbers<[1], [0], [0], [1], [0, 0, 1, 1], [], []>} : vector<4x64xf32>, vector<64x64xf32>, vector<4x64xf32> -> vector<4x64xf32>
    %65 = arith.addf %60, %64 : vector<4x64xf32>
    %c2_65 = arith.constant 2 : index
    %c0_66 = arith.constant 0 : index
    %66 = tpu.strided_load %arg14[%c2_65, %c0_66] {strides = array<i32: 2, 1>} : memref<10x64xf32, #tpu.memory_space<vmem>>, vector<4x64xf32>
    %c2_67 = arith.constant 2 : index
    %c0_68 = arith.constant 0 : index
    %c0_69 = arith.constant 0 : index
    %67 = vector.load %arg4[%c2_67, %c0_68, %c0_69] : memref<3x64x64xf32, #tpu.memory_space<vmem>>, vector<1x64x64xf32>
    %68 = vector.shape_cast %67 : vector<1x64x64xf32> to vector<64x64xf32>
    %cst_70 = arith.constant dense<0.000000e+00> : vector<4x64xf32>
    %69 = tpu.matmul %66, %68, %cst_70 {dimension_numbers = #tpu.dot_dimension_numbers<[1], [0], [0], [1], [0, 0, 1, 1], [], []>} : vector<4x64xf32>, vector<64x64xf32>, vector<4x64xf32> -> vector<4x64xf32>
    %70 = arith.addf %65, %69 : vector<4x64xf32>
    %71 = arith.addf %70, %50 : vector<4x64xf32>
    %cst_71 = arith.constant 0.000000e+00 : f32
    %72 = vector.broadcast %cst_71 : f32 to vector<4x64xf32>
    %73 = arith.maximumf %71, %72 : vector<4x64xf32>
    %74 = arith.mulf %73, %53 : vector<4x64xf32>
    %75 = arith.addf %74, %56 : vector<4x64xf32>
    %c1_72 = arith.constant 1 : index
    %c0_73 = arith.constant 0 : index
    %76 = vector.load %arg15[%c1_72, %c0_73] : memref<6x64xf32, #tpu.memory_space<vmem>>, vector<4x64xf32>
    tpu.vector_store %arg15[%c1_72, %c0_73], %75 {strides = array<i32>} : memref<6x64xf32, #tpu.memory_space<vmem>>, vector<4x64xf32>,
    %c0_74 = arith.constant 0 : index
    %c0_75 = arith.constant 0 : index
    %77 = vector.load %arg7[%c0_74, %c0_75] : memref<3x64xf32, #tpu.memory_space<vmem>>, vector<1x64xf32>
    %78 = vector.shape_cast %77 : vector<1x64xf32> to vector<1x64xf32>
    %79 = vector.broadcast %78 : vector<1x64xf32> to vector<2x64xf32>
    %c1_76 = arith.constant 1 : index
    %c0_77 = arith.constant 0 : index
    %80 = vector.load %arg7[%c1_76, %c0_77] : memref<3x64xf32, #tpu.memory_space<vmem>>, vector<1x64xf32>
    %81 = vector.shape_cast %80 : vector<1x64xf32> to vector<1x64xf32>
    %82 = vector.broadcast %81 : vector<1x64xf32> to vector<2x64xf32>
    %c2_78 = arith.constant 2 : index
    %c0_79 = arith.constant 0 : index
    %83 = vector.load %arg7[%c2_78, %c0_79] : memref<3x64xf32, #tpu.memory_space<vmem>>, vector<1x64xf32>
    %84 = vector.shape_cast %83 : vector<1x64xf32> to vector<1x64xf32>
    %85 = vector.broadcast %84 : vector<1x64xf32> to vector<2x64xf32>
    %c0_80 = arith.constant 0 : index
    %c0_81 = arith.constant 0 : index
    %86 = tpu.strided_load %arg15[%c0_80, %c0_81] {strides = array<i32: 2, 1>} : memref<6x64xf32, #tpu.memory_space<vmem>>, vector<2x64xf32>
    %c0_82 = arith.constant 0 : index
    %c0_83 = arith.constant 0 : index
    %c0_84 = arith.constant 0 : index
    %87 = vector.load %arg6[%c0_82, %c0_83, %c0_84] : memref<3x64x64xf32, #tpu.memory_space<vmem>>, vector<1x64x64xf32>
    %88 = vector.shape_cast %87 : vector<1x64x64xf32> to vector<64x64xf32>
    %cst_85 = arith.constant dense<0.000000e+00> : vector<2x64xf32>
    %89 = tpu.matmul %86, %88, %cst_85 {dimension_numbers = #tpu.dot_dimension_numbers<[1], [0], [0], [1], [0, 0, 1, 1], [], []>} : vector<2x64xf32>, vector<64x64xf32>, vector<2x64xf32> -> vector<2x64xf32>
    %c1_86 = arith.constant 1 : index
    %c0_87 = arith.constant 0 : index
    %90 = tpu.strided_load %arg15[%c1_86, %c0_87] {strides = array<i32: 2, 1>} : memref<6x64xf32, #tpu.memory_space<vmem>>, vector<2x64xf32>
    %c1_88 = arith.constant 1 : index
    %c0_89 = arith.constant 0 : index
    %c0_90 = arith.constant 0 : index
    %91 = vector.load %arg6[%c1_88, %c0_89, %c0_90] : memref<3x64x64xf32, #tpu.memory_space<vmem>>, vector<1x64x64xf32>
    %92 = vector.shape_cast %91 : vector<1x64x64xf32> to vector<64x64xf32>
    %cst_91 = arith.constant dense<0.000000e+00> : vector<2x64xf32>
    %93 = tpu.matmul %90, %92, %cst_91 {dimension_numbers = #tpu.dot_dimension_numbers<[1], [0], [0], [1], [0, 0, 1, 1], [], []>} : vector<2x64xf32>, vector<64x64xf32>, vector<2x64xf32> -> vector<2x64xf32>
    %94 = arith.addf %89, %93 : vector<2x64xf32>
    %c2_92 = arith.constant 2 : index
    %c0_93 = arith.constant 0 : index
    %95 = tpu.strided_load %arg15[%c2_92, %c0_93] {strides = array<i32: 2, 1>} : memref<6x64xf32, #tpu.memory_space<vmem>>, vector<2x64xf32>
    %c2_94 = arith.constant 2 : index
    %c0_95 = arith.constant 0 : index
    %c0_96 = arith.constant 0 : index
    %96 = vector.load %arg6[%c2_94, %c0_95, %c0_96] : memref<3x64x64xf32, #tpu.memory_space<vmem>>, vector<1x64x64xf32>
    %97 = vector.shape_cast %96 : vector<1x64x64xf32> to vector<64x64xf32>
    %cst_97 = arith.constant dense<0.000000e+00> : vector<2x64xf32>
    %98 = tpu.matmul %95, %97, %cst_97 {dimension_numbers = #tpu.dot_dimension_numbers<[1], [0], [0], [1], [0, 0, 1, 1], [], []>} : vector<2x64xf32>, vector<64x64xf32>, vector<2x64xf32> -> vector<2x64xf32>
    %99 = arith.addf %94, %98 : vector<2x64xf32>
    %100 = arith.addf %99, %79 : vector<2x64xf32>
    %cst_98 = arith.constant 0.000000e+00 : f32
    %101 = vector.broadcast %cst_98 : f32 to vector<2x64xf32>
    %102 = arith.maximumf %100, %101 : vector<2x64xf32>
    %103 = arith.mulf %102, %82 : vector<2x64xf32>
    %104 = arith.addf %103, %85 : vector<2x64xf32>
    %c1_99 = arith.constant 1 : index
    %c0_100 = arith.constant 0 : index
    %105 = vector.load %arg16[%c1_99, %c0_100] : memref<4x64xf32, #tpu.memory_space<vmem>>, vector<2x64xf32>
    tpu.vector_store %arg16[%c1_99, %c0_100], %104 {strides = array<i32>} : memref<4x64xf32, #tpu.memory_space<vmem>>, vector<2x64xf32>,
    %c0_101 = arith.constant 0 : index
    %c0_102 = arith.constant 0 : index
    %106 = vector.load %arg9[%c0_101, %c0_102] : memref<3x64xf32, #tpu.memory_space<vmem>>, vector<1x64xf32>
    %c1_103 = arith.constant 1 : index
    %c0_104 = arith.constant 0 : index
    %107 = vector.load %arg9[%c1_103, %c0_104] : memref<3x64xf32, #tpu.memory_space<vmem>>, vector<1x64xf32>
    %c2_105 = arith.constant 2 : index
    %c0_106 = arith.constant 0 : index
    %108 = vector.load %arg9[%c2_105, %c0_106] : memref<3x64xf32, #tpu.memory_space<vmem>>, vector<1x64xf32>
    %c0_107 = arith.constant 0 : index
    %c0_108 = arith.constant 0 : index
    %109 = vector.load %arg16[%c0_107, %c0_108] : memref<4x64xf32, #tpu.memory_space<vmem>>, vector<1x64xf32>
    %c0_109 = arith.constant 0 : index
    %c0_110 = arith.constant 0 : index
    %c0_111 = arith.constant 0 : index
    %110 = vector.load %arg8[%c0_109, %c0_110, %c0_111] : memref<3x64x64xf32, #tpu.memory_space<vmem>>, vector<1x64x64xf32>
    %111 = vector.shape_cast %110 : vector<1x64x64xf32> to vector<64x64xf32>
    %cst_112 = arith.constant dense<0.000000e+00> : vector<1x64xf32>
    %112 = tpu.matmul %109, %111, %cst_112 {dimension_numbers = #tpu.dot_dimension_numbers<[1], [0], [0], [1], [0, 0, 1, 1], [], []>} : vector<1x64xf32>, vector<64x64xf32>, vector<1x64xf32> -> vector<1x64xf32>
    %c1_113 = arith.constant 1 : index
    %c0_114 = arith.constant 0 : index
    %113 = vector.load %arg16[%c1_113, %c0_114] : memref<4x64xf32, #tpu.memory_space<vmem>>, vector<1x64xf32>
    %c1_115 = arith.constant 1 : index
    %c0_116 = arith.constant 0 : index
    %c0_117 = arith.constant 0 : index
    %114 = vector.load %arg8[%c1_115, %c0_116, %c0_117] : memref<3x64x64xf32, #tpu.memory_space<vmem>>, vector<1x64x64xf32>
    %115 = vector.shape_cast %114 : vector<1x64x64xf32> to vector<64x64xf32>
    %cst_118 = arith.constant dense<0.000000e+00> : vector<1x64xf32>
    %116 = tpu.matmul %113, %115, %cst_118 {dimension_numbers = #tpu.dot_dimension_numbers<[1], [0], [0], [1], [0, 0, 1, 1], [], []>} : vector<1x64xf32>, vector<64x64xf32>, vector<1x64xf32> -> vector<1x64xf32>
    %117 = arith.addf %112, %116 : vector<1x64xf32>
    %c2_119 = arith.constant 2 : index
    %c0_120 = arith.constant 0 : index
    %118 = vector.load %arg16[%c2_119, %c0_120] : memref<4x64xf32, #tpu.memory_space<vmem>>, vector<1x64xf32>
    %c2_121 = arith.constant 2 : index
    %c0_122 = arith.constant 0 : index
    %c0_123 = arith.constant 0 : index
    %119 = vector.load %arg8[%c2_121, %c0_122, %c0_123] : memref<3x64x64xf32, #tpu.memory_space<vmem>>, vector<1x64x64xf32>
    %120 = vector.shape_cast %119 : vector<1x64x64xf32> to vector<64x64xf32>
    %cst_124 = arith.constant dense<0.000000e+00> : vector<1x64xf32>
    %121 = tpu.matmul %118, %120, %cst_124 {dimension_numbers = #tpu.dot_dimension_numbers<[1], [0], [0], [1], [0, 0, 1, 1], [], []>} : vector<1x64xf32>, vector<64x64xf32>, vector<1x64xf32> -> vector<1x64xf32>
    %122 = arith.addf %117, %121 : vector<1x64xf32>
    %123 = arith.addf %122, %106 : vector<1x64xf32>
    %cst_125 = arith.constant 0.000000e+00 : f32
    %124 = vector.broadcast %cst_125 : f32 to vector<1x64xf32>
    %125 = arith.maximumf %123, %124 : vector<1x64xf32>
    %126 = arith.mulf %125, %107 : vector<1x64xf32>
    %127 = arith.addf %126, %108 : vector<1x64xf32>
    %cst_126 = arith.constant dense<0.000000e+00> : vector<64xf32>
    %128 = vector.multi_reduction <add>, %127, %cst_126 [0] : vector<1x64xf32> to vector<64xf32>
    %129 = vector.shape_cast %128 : vector<64xf32> to vector<1x64xf32>
    %c0_127 = arith.constant 0 : index
    %c0_128 = arith.constant 0 : index
    %130 = vector.load %arg17[%c0_127, %c0_128] : memref<1x64xf32, #tpu.memory_space<vmem>>, vector<1x64xf32>
    tpu.vector_store %arg17[%c0_127, %c0_128], %129 {strides = array<i32>} : memref<1x64xf32, #tpu.memory_space<vmem>>, vector<1x64xf32>,
    %c0_129 = arith.constant 0 : index
    %c0_130 = arith.constant 0 : index
    %131 = vector.load %arg17[%c0_129, %c0_130] : memref<1x64xf32, #tpu.memory_space<vmem>>, vector<1x64xf32>
    %c0_131 = arith.constant 0 : index
    %c0_132 = arith.constant 0 : index
    %132 = vector.load %arg10[%c0_131, %c0_132] : memref<64x128xf32, #tpu.memory_space<vmem>>, vector<64x128xf32>
    %cst_133 = arith.constant dense<0.000000e+00> : vector<1x128xf32>
    %133 = tpu.matmul %131, %132, %cst_133 {dimension_numbers = #tpu.dot_dimension_numbers<[1], [0], [0], [1], [0, 0, 1, 1], [], []>} : vector<1x64xf32>, vector<64x128xf32>, vector<1x128xf32> -> vector<1x128xf32>
    %c0_134 = arith.constant 0 : index
    %c0_135 = arith.constant 0 : index
    %134 = vector.load %arg11[%c0_134, %c0_135] : memref<1x128xf32, #tpu.memory_space<vmem>>, vector<1x128xf32>
    %135 = arith.addf %133, %134 : vector<1x128xf32>
    %c0_136 = arith.constant 0 : index
    %c0_137 = arith.constant 0 : index
    %c0_138 = arith.constant 0 : index
    %136 = vector.load %arg12[%c0_136, %c0_137, %c0_138] : memref<1x1x128xf32, #tpu.memory_space<vmem>>, vector<1x1x128xf32>
    %137 = vector.shape_cast %136 : vector<1x1x128xf32> to vector<1x128xf32>
    %138 = vector.shape_cast %135 : vector<1x128xf32> to vector<1x1x128xf32>
    tpu.vector_store %arg12[%c0_136, %c0_137, %c0_138], %138 {strides = array<i32>} : memref<1x1x128xf32, #tpu.memory_space<vmem>>, vector<1x1x128xf32>,
    return
  }
  func.func @transform_0(%arg0: i32) -> (i32, i32, i32) {
    %c0_i32 = arith.constant 0 : i32
    %c0_i32_0 = arith.constant 0 : i32
    %c0_i32_1 = arith.constant 0 : i32
    return %arg0, %c0_i32, %c0_i32_0 : i32, i32, i32
  }
  func.func @transform_1(%arg0: i32) -> (i32, i32, i32) {
    %c0_i32 = arith.constant 0 : i32
    %c0_i32_0 = arith.constant 0 : i32
    %c0_i32_1 = arith.constant 0 : i32
    %c0_i32_2 = arith.constant 0 : i32
    return %c0_i32, %c0_i32_0, %c0_i32_1 : i32, i32, i32
  }
  func.func @transform_2(%arg0: i32) -> (i32, i32) {
    %c0_i32 = arith.constant 0 : i32
    %c0_i32_0 = arith.constant 0 : i32
    %c0_i32_1 = arith.constant 0 : i32
    return %c0_i32, %c0_i32_0 : i32, i32
  }
  func.func @transform_3(%arg0: i32) -> (i32, i32, i32) {
    %c0_i32 = arith.constant 0 : i32
    %c0_i32_0 = arith.constant 0 : i32
    %c0_i32_1 = arith.constant 0 : i32
    %c0_i32_2 = arith.constant 0 : i32
    return %c0_i32, %c0_i32_0, %c0_i32_1 : i32, i32, i32
  }
  func.func @transform_4(%arg0: i32) -> (i32, i32) {
    %c0_i32 = arith.constant 0 : i32
    %c0_i32_0 = arith.constant 0 : i32
    %c0_i32_1 = arith.constant 0 : i32
    return %c0_i32, %c0_i32_0 : i32, i32
  }
  func.func @transform_5(%arg0: i32) -> (i32, i32, i32) {
    %c0_i32 = arith.constant 0 : i32
    %c0_i32_0 = arith.constant 0 : i32
    %c0_i32_1 = arith.constant 0 : i32
    %c0_i32_2 = arith.constant 0 : i32
    return %c0_i32, %c0_i32_0, %c0_i32_1 : i32, i32, i32
  }
  func.func @transform_6(%arg0: i32) -> (i32, i32) {
    %c0_i32 = arith.constant 0 : i32
    %c0_i32_0 = arith.constant 0 : i32
    %c0_i32_1 = arith.constant 0 : i32
    return %c0_i32, %c0_i32_0 : i32, i32
  }
  func.func @transform_7(%arg0: i32) -> (i32, i32, i32) {
    %c0_i32 = arith.constant 0 : i32
    %c0_i32_0 = arith.constant 0 : i32
    %c0_i32_1 = arith.constant 0 : i32
    %c0_i32_2 = arith.constant 0 : i32
    return %c0_i32, %c0_i32_0, %c0_i32_1 : i32, i32, i32
  }
  func.func @transform_8(%arg0: i32) -> (i32, i32) {
    %c0_i32 = arith.constant 0 : i32
    %c0_i32_0 = arith.constant 0 : i32
    %c0_i32_1 = arith.constant 0 : i32
    return %c0_i32, %c0_i32_0 : i32, i32
  }
  func.func @transform_9(%arg0: i32) -> (i32, i32) {
    %c0_i32 = arith.constant 0 : i32
    %c0_i32_0 = arith.constant 0 : i32
    %c0_i32_1 = arith.constant 0 : i32
    return %c0_i32, %c0_i32_0 : i32, i32
  }
  func.func @transform_10(%arg0: i32) -> (i32, i32) {
    %c0_i32 = arith.constant 0 : i32
    %c0_i32_0 = arith.constant 0 : i32
    %c0_i32_1 = arith.constant 0 : i32
    return %c0_i32, %c0_i32_0 : i32, i32
  }
  func.func @transform_11(%arg0: i32) -> (i32, i32, i32) {
    %c0_i32 = arith.constant 0 : i32
    %c0_i32_0 = arith.constant 0 : i32
    %c0_i32_1 = arith.constant 0 : i32
    return %arg0, %c0_i32, %c0_i32_0 : i32, i32, i32
  }
}

</mosaic_0001>

<bundles_post_ra>
// kernel: tpu_custom_call.1
= control target key start
LH: loop header
LB: loop body
LE: loop exit
PB: predicated region body
PF: predicated region fallthrough
CT: control target
= control target key end

     0   :  { %s1713_s0 = inlined_call_operand.vmem [shape: f32[2,20,32], index: 0, kind: input, shape index: {}]   ;;  %s1714_s1 = inlined_call_operand.hbm [shape: f32[5,32,64], index: 1, kind: input, shape index: {}]   ;;  %s1715_s2 = inlined_call_operand.vmem [shape: f32[3,64], index: 2, kind: input, shape index: {}]   ;;  %s1716_s3 = inlined_call_operand.hbm [shape: f32[3,64,64], index: 3, kind: input, shape index: {}]   ;;  %s1717_s4 = inlined_call_operand.vmem [shape: f32[3,64], index: 4, kind: input, shape index: {}]   ;;  %s1718_s5 = inlined_call_operand.hbm [shape: f32[3,64,64], index: 5, kind: input, shape index: {}]   ;;  %s1719_s6 = inlined_call_operand.vmem [shape: f32[3,64], index: 6, kind: input, shape index: {}]   ;;  %s1720_s7 = inlined_call_operand.hbm [shape: f32[3,64,64], index: 7, kind: input, shape index: {}]   ;;  %s1721_s8 = inlined_call_operand.vmem [shape: f32[3,64], index: 8, kind: input, shape index: {}]   ;;  %s1722_s9 = inlined_call_operand.vmem [shape: f32[64,128], index: 9, kind: input, shape index: {}]   ;;  %s1723_s10 = inlined_call_operand.vmem [shape: f32[1,128], index: 10, kind: input, shape index: {}]   ;;  %s1724_s11 = inlined_call_operand.hbm [shape: f32[2,1,128], index: 11, kind: output, shape index: {}]  }
   0x1   :  { %1730 = sst [smem:[#allocation25_spill]] %s1714_s1 }
   0x2   :  { %1731 = sst [smem:[#allocation26_spill]] %s1716_s3 }
   0x3   :  { %16 = vsyncpa [#allocation8], 0 }
   0x4   :  { %17 = vsyncpa [#allocation11], 0 }
   0x5   :  { %18 = vsyncpa [#allocation14], 0 }
   0x6   :  { %19 = vsyncpa [#allocation9], 0 }
   0x7   :  { %21 = vsyncpa [#allocation9 + $0x1], 0  ;;  %s1491_s17 = smov 0   ;;  %s1493_s18 = smov 0  }
   0x8   :  { %s1495_s19 = smov 0   ;;  %s1497_s20 = smov 0  }
   0x9 LB: > { %1732 = sst [smem:[#allocation20_spill]] %s1410_s17  ;;  %s1512_s21 = sadd.s32 4294967295, %s1422_s20   ;;  %s1422_s20 = sphi %s1497_s20, %s1745_s20   ;;  %s1418_s19 = sphi %s1495_s19, %s1747_s19   ;;  %s1414_s18 = sphi %s1493_s18, %s1749_s18   ;;  %s1410_s17 = sphi %s1491_s17, %s1748_s17  }
   0xa   : > { %1733 = sst [smem:[#allocation21_spill]] %s1418_s19  ;;  %s1105_s22 = sadd.s32 4294967294, %s1422_s20  }
   0xb   : > { %s1516_s23 = sadd.s32 1, %s1422_s20   ;;  %s270_s24 = sadd.s32 1, %s1418_s19 }
   0xc   : > { %1734 = sst [smem:[#allocation22_spill]] %s1516_s23  ;;  %s267_s25 = ssub.s32 %s1422_s20, %s1516_s23 }
   0xd   : > { %p280_p0 = scmp.ne.s32.totalorder %s1418_s19, %s1414_s18  ;;  %p268_p1 = scmp.eq.s32.totalorder %s267_s25, 0 }
   0xe   : > { %p281_p2 = scmp.eq.s32.totalorder %s1512_s21, 1  ;;  %p286_p3 = scmp.ne.s32.totalorder %s1414_s18, %s1410_s17 }
   0xf   : > { %p287_p4 = scmp.eq.s32.totalorder %s1105_s22, 1  ;;  %p1106_p7 = scmp.ge.s32.totalorder %s1422_s20, 1 }
  0x10   : > { %s1527_s26 = scalar_select %p268_p1, %s1418_s19, %s270_s24  }
  0x11   : > { %p1529_p5 = por %p281_p2, %p280_p0  ;;  %p1533_p6 = por %p287_p4, %p286_p3 }
  0x12   : > { %1735 = sst [smem:[#allocation23_spill]] %s1527_s26  ;;  %p294_p8 = scmp.lt.s32.totalorder %s1422_s20, 3 }
  0x13   : > { %s1737_s28 = scalar_select %p1533_p6, 1, 0 }
  0x14   : > { %p1171_p9 = scmp.eq.s32.totalorder %s1512_s21, 0  ;;  %p1540_p10 = pnand %p1106_p7, %p294_p8 }
  0x15   : > { %1738 = sst [smem:[#allocation24_spill]] %s1737_s28  ;;  %s1424_s24 = smov [#allocation10]  }
  0x16   : > { %s1740_s3 = sld [smem:[#allocation26_spill]]  ;;  %p1154_p11 = pneg %p1540_p10 }
  0x17   : > { %s1741_s1 = sld [smem:[#allocation25_spill]]  ;;  %s324_s25 = sshll.u32 %s1424_s24, 4  ;;  %s325_s25 = int_to_ptr.vmem [resolvable:$true] %s324_s25 }
  0x18   : > { %p1554_p12 = pnand %p1171_p9, %p1154_p11  ;;  %s1425_s30 = smov 128  }
  0x19   : > { %s1426_s12 = smov 8   ;;  %s339_s26 = sshll.u32 %s1718_s5, 4  ;;  %s340_s26 = int_to_ptr.hbm [resolvable:$true] %s339_s26 }
  0x1a   : > { %s356_s23 = sshll.u32 %s1720_s7, 4  ;;  %s1428_s28 = smov [#allocation12]   ;;  %s357_s23 = int_to_ptr.hbm [resolvable:$true] %s356_s23 }
  0x1b   : > { %s341_s17 = sshll.u32 %s1428_s28, 4  ;;  %s342_s17 = int_to_ptr.vmem [resolvable:$true] %s341_s17 }
  0x1c   : > { %s322_s13 = sshll.u32 %s1740_s3, 4  ;;  %s1427_s3 = smov [#allocation7]   ;;  %s323_s13 = int_to_ptr.hbm [resolvable:$true] %s322_s13 }
  0x1d   : > { %s305_s16 = sshll.u32 %s1741_s1, 4  ;;  %s307_s14 = sshll.u32 %s1427_s3, 4  ;;  %s306_s16 = int_to_ptr.hbm [resolvable:$true] %s305_s16  ;;  %s308_s14 = int_to_ptr.vmem [resolvable:$true] %s307_s14 }
  0x1e   : > { %1160 = dma.hbm_to_vmem [thread:$0]  (!%p1554_p12), %s323_s13, 3072, %s325_s25, [#allocation11], %s1425_s30, %s1425_s30, %s1426_s12  }
  0x1f   : > { %1157 = dma.hbm_to_vmem [thread:$0]  (!%p1554_p12), %s306_s16, 2560, %s308_s14, [#allocation8], %s1425_s30, %s1425_s30, %s1426_s12  }
  0x20   : > { %1163 = dma.hbm_to_vmem [thread:$0]  (!%p1554_p12), %s340_s26, 3072, %s342_s17, [#allocation11], %s1425_s30, %s1425_s30, %s1426_s12  }
  0x21   : > { %s1429_s13 = smov [#allocation13]   ;;  %391 = sbr.rel (%p1540_p10) target bundleno = 812 (0x32c), region = 64 }
  0x22   : > { %s358_s3 = sshll.u32 %s1429_s13, 4  ;;  %s359_s3 = int_to_ptr.vmem [resolvable:$true] %s358_s3 }
  0x23   : > { %1166 = dma.hbm_to_vmem [thread:$0]  (!%p1554_p12), %s357_s23, 3072, %s359_s3, [#allocation14], %s1425_s30, %s1425_s30, %s1426_s12  }
  0x26   : > { %1393 = dma.done.wait (%p1171_p9), [#allocation8], 2560  }
  0x27   : > { %1395 = vsyncadd (%p1171_p9), [#allocation8], 4294964736 }
  0x28   : > { %1397 = dma.done.wait (%p1171_p9), [#allocation11], 6144  }
  0x29   : > { %1399 = vsyncadd (%p1171_p9), [#allocation11], 4294961152 }
  0x2a   : > { %1401 = dma.done.wait (%p1171_p9), [#allocation14], 3072  }
  0x2b   : > { %1403 = vsyncadd (%p1171_p9), [#allocation14], 4294964224  ;;  %p446_p13 = scmp.lt.s32.totalorder %s1512_s21, 1  ;;  %v477_v0 = vld [vmem:[#allocation7 + $0x18] sm:$0xff]  ;;  %v476_v1 = vld [vmem:[#allocation7 + $0x10] sm:$0xff]  ;;  %vm462_vm0 = vcmask 261120   ;;  %s1005_s24 = scalar_lea.hbm %s1724_s11, %s1512_s21 }
  0x2c   : > { %v537_v2 = vld [vmem:[#allocation7 + $0x58] sm:$0xff]  ;;  %523 = vmatpush.msra.mxu3 %v477_v0  ;;  %v536_v3 = vld [vmem:[#allocation7 + $0x50] sm:$0xff]  ;;  %v475_v5 = vld [vmem:[#allocation7 + $0x8] sm:$0xff]  ;;  %vm465_vm1 = vcmask 257024   ;;  %vm451_vm2 = vcmask 523264   ;;  %vm453_vm3 = vcmask 517120  }
  0x2d   : > { %s447_s1 = scalar_select %p446_p13, %s1512_s21, 1  ;;  %553 = vmatpush.msra.mxu2 %v537_v2  ;;  %v484_v4 = vld [vmem:[#allocation7 + $0x38] sm:$0xff]  ;;  %v535_v6 = vld [vmem:[#allocation7 + $0x48] sm:$0xff]  ;;  %v474_v10 = vld [vmem:[#allocation7] sm:$0xff]  ;;  %v1430_v28 = vmov 0.0   ;;  %vm455_vm4 = vcmask 521216  }
  0x2e   : > { %500 = vmatpush.msra.mxu0 %v484_v4  ;;  %524 = vmatpush.msra.mxu3 %v476_v1  ;;  %v483_v11 = vld [vmem:[#allocation7 + $0x30] sm:$0xff]  ;;  %v534_v12 = vld [vmem:[#allocation7 + $0x40] sm:$0xff]  ;;  %v568_v13 = vld [vmem:[#allocation7 + $0x78] sm:$0xff]  ;;  %452 = vst.msk [vmem:[#allocation3] sm:$0xff] %vm451_vm2, %v1430_v28  ;;  %vm457_vm5 = vcmask 519168   ;;  %vm960_vm6 = vcmask 516096  }
  0x2f   : > { %s1135_s17 = smul.u32 24, %s447_s1  ;;  %554 = vmatpush.msra.mxu2 %v536_v3  ;;  %v482_v14 = vld [vmem:[#allocation7 + $0x28] sm:$0xff]  ;;  %v567_v15 = vld [vmem:[#allocation7 + $0x70] sm:$0xff]  ;;  %v481_v16 = vld [vmem:[#allocation7 + $0x20] sm:$0xff]  ;;  %454 = vst.msk [vmem:[#allocation3 + $0x8] sm:$0x3] %vm453_vm3, %v1430_v28 }
  0x30   : > { %525 = vmatpush.msra.mxu3 %v475_v5  ;;  %501 = vmatpush.msra.mxu0 %v483_v11  ;;  %v599_v17 = vld [vmem:[#allocation7 + $0x98] sm:$0xff]  ;;  %v566_v18 = vld [vmem:[#allocation7 + $0x68] sm:$0xff]  ;;  %v598_v21 = vld [vmem:[#allocation7 + $0x90] sm:$0xff]  ;;  %456 = vst.msk [vmem:[#allocation4] sm:$0x3f] %vm455_vm4, %v1430_v28  ;;  %s444_s12 = sand.u32 1, %s1414_s18  }
  0x31   : > { %s450_s26 = scalar_lea.vmem %s1713_s0, %s1135_s17  ;;  %555 = vmatpush.msra.mxu2 %v535_v6  ;;  %v565_v23 = vld [vmem:[#allocation7 + $0x60] sm:$0xff]  ;;  %v597_v24 = vld [vmem:[#allocation7 + $0x88] sm:$0xff]  ;;  %v654_v29 = vld [vmem:[#allocation10 + $0x78] sm:$0xff]  ;;  %458 = vst.msk [vmem:[#allocation5] sm:$0xf] %vm457_vm5, %v1430_v28  ;;  %s445_s1 = scalar_lea.vmem [#allocation15], %s444_s12 }
  0x32   : > { %v459_v7 = vld [vmem:[%s450_s26] sm:$0xff]  ;;  %v460_v8 = vld [vmem:[%s450_s26 + $0x8] sm:$0xff]  ;;  %v461_v9 = vld [vmem:[%s450_s26 + $0x10] sm:$0xf]  ;;  %526 = vmatpush.msra.mxu3 %v474_v10  ;;  %502 = vmatpush.msra.mxu0 %v482_v14  ;;  %s1007_s17 = sshll.u32 %s445_s1, 4  ;;  %s1009_s19 = sshll.u32 %s1005_s24, 4  ;;  %s1008_s17 = int_to_ptr.vmem [resolvable:$true] %s1007_s17  ;;  %s1010_s19 = int_to_ptr.hbm [resolvable:$true] %s1009_s19 }
  0x33   : > { %463 = vst.msk [vmem:[#allocation2] sm:$0xff] %vm462_vm0, %v459_v7  ;;  %556 = vmatpush.msra.mxu2 %v534_v12  ;;  %v596_v25 = vld [vmem:[#allocation7 + $0x80] sm:$0xff]  ;;  %v643_v30 = vld [vmem:[#allocation10 + $0x38] sm:$0xff]  ;;  %666 = vmatpush.msra.mxu1 %v654_v29  ;;  %v653_v32 = vld [vmem:[#allocation10 + $0x70] sm:$0xff]  ;;  %s997_s23 = scalar_lea.sflag [#allocation9], %s444_s12  ;;  %s1362_s26 = sshra.s32 %s1010_s19, 4  ;;  %s1363_s26 = int_to_ptr.hbm [resolvable:$true] %s1362_s26 }
  0x34   : > { %464 = vst.msk [vmem:[#allocation2 + $0x8] sm:$0xff] %vm462_vm0, %v460_v8  ;;  %584 = vmatpush.msrb.mxu3 %v568_v13  ;;  %503 = vmatpush.msra.mxu0 %v481_v16  ;;  %v711_v31 = vld [vmem:[#allocation10 + $0xb8] sm:$0xff]  ;;  %v642_v33 = vld [vmem:[#allocation10 + $0x30] sm:$0xff]  ;;  %v652_v35 = vld [vmem:[#allocation10 + $0x68] sm:$0xff]  ;;  %s1364_s28 = scalar_lea.hbm %s1363_s26, 1  ;;  %s1368_s16 = scalar_lea.hbm %s1724_s11, 2 }
  0x35   : > { %466 = vst.msk [vmem:[#allocation2 + $0x10] sm:$0xf] %vm465_vm1, %v461_v9  ;;  %689 = vmatpush.msrb.mxu2 %v643_v30  ;;  %v710_v34 = vld [vmem:[#allocation10 + $0xb0] sm:$0xff]  ;;  %667 = vmatpush.msra.mxu1 %v653_v32  ;;  %v641_v36 = vld [vmem:[#allocation10 + $0x28] sm:$0xff]  ;;  %v651_v38 = vld [vmem:[#allocation10 + $0x60] sm:$0xff]  ;;  %p1365_p0 = scmp.ne.s32.totalorder %s1363_s26, %s1364_s28  ;;  %p1369_p3 = scmp.lt.s32.totalorder %s1363_s26, %s1724_s11 }
  0x36   : > { %585 = vmatpush.msrb.mxu3 %v567_v15  ;;  %615 = vmatpush.msrb.mxu0 %v599_v17  ;;  %v709_v37 = vld [vmem:[#allocation10 + $0xa8] sm:$0xff]  ;;  %v640_v39 = vld [vmem:[#allocation10 + $0x20] sm:$0xff]  ;;  %v650_v41 = vld [vmem:[#allocation10 + $0x58] sm:$0xff]  ;;  %p1370_p4 = scmp.lt.s32.totalorder %s1368_s16, %s1364_s28 }
  0x37   : > { %690 = vmatpush.msrb.mxu2 %v642_v33  ;;  %668 = vmatpush.msra.mxu1 %v652_v35  ;;  %v708_v40 = vld [vmem:[#allocation10 + $0xa0] sm:$0xff]  ;;  %v639_v42 = vld [vmem:[#allocation10 + $0x18] sm:$0xff]  ;;  %v649_v44 = vld [vmem:[#allocation10 + $0x50] sm:$0xff]  ;;  %p1366_p1 = pnand %p1365_p0, %p1529_p5 }
  0x38   : > { %586 = vmatpush.msrb.mxu3 %v566_v18  ;;  %616 = vmatpush.msrb.mxu0 %v598_v21  ;;  %v707_v43 = vld [vmem:[#allocation10 + $0x98] sm:$0xff]  ;;  %v638_v45 = vld [vmem:[#allocation10 + $0x10] sm:$0xff]  ;;  %v648_v47 = vld [vmem:[#allocation10 + $0x48] sm:$0xff]  ;;  %p1371_p7 = por %p1370_p4, %p1369_p3 }
  0x39   : > { %691 = vmatpush.msrb.mxu2 %v641_v36  ;;  %669 = vmatpush.msra.mxu1 %v651_v38  ;;  %v706_v46 = vld [vmem:[#allocation10 + $0x90] sm:$0xff]  ;;  %v637_v48 = vld [vmem:[#allocation10 + $0x8] sm:$0xff]  ;;  %v647_v50 = vld [vmem:[#allocation10 + $0x40] sm:$0xff]  ;;  %p1367_p2 = pneg %p1366_p1 }
  0x3a   : > { %587 = vmatpush.msrb.mxu3 %v565_v23  ;;  %617 = vmatpush.msrb.mxu0 %v597_v24  ;;  %v705_v49 = vld [vmem:[#allocation10 + $0x88] sm:$0xff]  ;;  %v636_v51 = vld [vmem:[#allocation10] sm:$0xff]  ;;  %v766_v8 = vld [vmem:[#allocation12 + $0x78] sm:$0xff] }
  0x3b   : > { %v473_v19 = vld [vmem:[#allocation2] ss:$2 sm:$0xff]  ;;  %v479_v20 = vld [vmem:[#allocation2 + $0x1] ss:$2 sm:$0xff]  ;;  %692 = vmatpush.msrb.mxu2 %v640_v39  ;;  %670 = vmatpush.msra.mxu1 %v650_v41  ;;  %v704_v52 = vld [vmem:[#allocation10 + $0x80] sm:$0xff]  ;;  %p1372_p8 = pnand %p1371_p7, %p1367_p2 }
  0x3c   : > { %1119 = vmatmul.msk.f32.vlgmr.msra.gmra.mxu3 %vm462_vm0, %v473_v19  ;;  %v532_v22 = vld [vmem:[#allocation2 + $0x2] ss:$2 sm:$0xff]  ;;  %1118 = vmatmul.msk.f32.vlgmr.msra.gmra.mxu0 %vm462_vm0, %v479_v20  ;;  %v563_v26 = vld [vmem:[#allocation2 + $0x3] ss:$2 sm:$0xff]  ;;  %v1219_v61 = vld [vmem:[%s1715_s2] ss:$0 sm:$0xff] }
  0x3d   : > { %1120 = vmatmul.msk.f32.vlgmr.msra.gmra.mxu2 %vm462_vm0, %v532_v22  ;;  %v594_v27 = vld [vmem:[#allocation2 + $0x4] ss:$2 sm:$0xff]  ;;  %618 = vmatpush.msrb.mxu0 %v596_v25  ;;  %v1220_v63 = vld [vmem:[%s1715_s2 + $0x1] ss:$0 sm:$0xff]  ;;  %v1221_v1 = vld [vmem:[%s1715_s2 + $0x2] ss:$0 sm:$0xff] }
  0x3e   : > { %723 = vmatpush.msra.mxu3 %v711_v31  ;;  %693 = vmatpush.msrb.mxu2 %v639_v42  ;;  %v755_v9 = vld [vmem:[#allocation12 + $0x38] sm:$0xff]  ;;  %v765_v11 = vld [vmem:[#allocation12 + $0x70] sm:$0xff]  ;;  %v764_v14 = vld [vmem:[#allocation12 + $0x68] sm:$0xff] }
  0x3f   : > { %671 = vmatpush.msra.mxu1 %v649_v44  ;;  %v823_v10 = vld [vmem:[#allocation12 + $0xb8] sm:$0xff]  ;;  %778 = vmatpush.msra.mxu0 %v766_v8  ;;  %v754_v12 = vld [vmem:[#allocation12 + $0x30] sm:$0xff]  ;;  %v753_v15 = vld [vmem:[#allocation12 + $0x28] sm:$0xff] }
  0x40   : > { %724 = vmatpush.msra.mxu3 %v710_v34  ;;  %694 = vmatpush.msrb.mxu2 %v638_v45  ;;  %v822_v13 = vld [vmem:[#allocation12 + $0xb0] sm:$0xff]  ;;  %v821_v16 = vld [vmem:[#allocation12 + $0xa8] sm:$0xff]  ;;  %v763_v17 = vld [vmem:[#allocation12 + $0x60] sm:$0xff] }
  0x41   : > { %672 = vmatpush.msra.mxu1 %v648_v47  ;;  %779 = vmatpush.msra.mxu0 %v765_v11  ;;  %v752_v18 = vld [vmem:[#allocation12 + $0x20] sm:$0xff]  ;;  %v762_v20 = vld [vmem:[#allocation12 + $0x58] sm:$0xff]  ;;  %v761_v23 = vld [vmem:[#allocation12 + $0x50] sm:$0xff] }
  0x42   : > { %725 = vmatpush.msra.mxu3 %v709_v37  ;;  %695 = vmatpush.msrb.mxu2 %v637_v48  ;;  %v820_v19 = vld [vmem:[#allocation12 + $0xa0] sm:$0xff]  ;;  %v751_v21 = vld [vmem:[#allocation12 + $0x18] sm:$0xff]  ;;  %v750_v24 = vld [vmem:[#allocation12 + $0x10] sm:$0xff] }
  0x43   : > { %673 = vmatpush.msra.mxu1 %v647_v50  ;;  %780 = vmatpush.msra.mxu0 %v764_v14  ;;  %v819_v22 = vld [vmem:[#allocation12 + $0x98] sm:$0xff]  ;;  %v818_v25 = vld [vmem:[#allocation12 + $0x90] sm:$0xff]  ;;  %v817_v28 = vld [vmem:[#allocation12 + $0x88] sm:$0xff] }
  0x44   : > { %1121 = vmatmul.msk.f32.vlgmr.msrb.gmra.mxu3 %vm462_vm0, %v563_v26  ;;  %1122 = vmatmul.msk.f32.vlgmr.msrb.gmra.mxu0 %vm462_vm0, %v594_v27  ;;  %v760_v26 = vld [vmem:[#allocation12 + $0x48] sm:$0xff]  ;;  %v759_v29 = vld [vmem:[#allocation12 + $0x40] sm:$0xff]  ;;  %v874_v47 = vld [vmem:[#allocation13 + $0x78] sm:$0xff] }
  0x45   : > { %726 = vmatpush.msra.mxu3 %v708_v40  ;;  %696 = vmatpush.msrb.mxu2 %v636_v51  ;;  %v749_v27 = vld [vmem:[#allocation12 + $0x8] sm:$0xff]  ;;  %v748_v30 = vld [vmem:[#allocation12] sm:$0xff]  ;;  %v930_v48 = vld [vmem:[#allocation13 + $0xb8] sm:$0xff] }
  0x46   : > { %801 = vmatpush.msrb.mxu1 %v755_v9  ;;  %781 = vmatpush.msra.mxu0 %v763_v17  ;;  %v816_v31 = vld [vmem:[#allocation12 + $0x80] sm:$0xff]  ;;  %v1222_v35 = vld [vmem:[%s1717_s4] ss:$0 sm:$0xff]  ;;  %v1223_v38 = vld [vmem:[%s1717_s4 + $0x1] ss:$0 sm:$0xff] }
  0x47   : > { %727 = vmatpush.msra.mxu3 %v707_v43  ;;  %835 = vmatpush.msra.mxu2 %v823_v10  ;;  %v1224_v40 = vld [vmem:[%s1717_s4 + $0x2] ss:$0 sm:$0xff]  ;;  %v929_v50 = vld [vmem:[#allocation13 + $0xb0] sm:$0xff]  ;;  %v1225_v11 = vld [vmem:[%s1719_s6] ss:$0 sm:$0xff] }
  0x48   : > { %802 = vmatpush.msrb.mxu1 %v754_v12  ;;  %782 = vmatpush.msra.mxu0 %v762_v20  ;;  %v872_v51 = vld [vmem:[#allocation13 + $0x68] sm:$0xff] }
  0x49   : > { %728 = vmatpush.msra.mxu3 %v706_v46  ;;  %836 = vmatpush.msra.mxu2 %v822_v13  ;;  %v1226_v14 = vld [vmem:[%s1719_s6 + $0x1] ss:$0 sm:$0xff] }
  0x4a   : > { %803 = vmatpush.msrb.mxu1 %v753_v15  ;;  %783 = vmatpush.msra.mxu0 %v761_v23  ;;  %v969_v23 = vld [vmem:[%s1722_s9 + $0x30] sm:$0xff] }
  0x4b   : > { %729 = vmatpush.msra.mxu3 %v705_v49  ;;  %837 = vmatpush.msra.mxu2 %v821_v16  ;;  %v873_v49 = vld [vmem:[#allocation13 + $0x70] sm:$0xff]  ;;  %v1227_v16 = vld [vmem:[%s1719_s6 + $0x2] ss:$0 sm:$0xff] }
  0x4c   : > { %804 = vmatpush.msrb.mxu1 %v752_v18  ;;  %784 = vmatpush.msra.mxu0 %v760_v26  ;;  %v966_v26 = vld [vmem:[%s1722_s9 + $0x18] sm:$0xff] }
  0x4d   : > { %730 = vmatpush.msra.mxu3 %v704_v52  ;;  %838 = vmatpush.msra.mxu2 %v820_v19  ;;  %v928_v52 = vld [vmem:[#allocation13 + $0xa8] sm:$0xff] }
  0x4e   : > { %805 = vmatpush.msrb.mxu1 %v751_v21  ;;  %785 = vmatpush.msra.mxu0 %v759_v29  ;;  %v963_v29 = vld [vmem:[%s1722_s9] sm:$0xff] }
  0x4f   : > { %839 = vmatpush.msra.mxu2 %v819_v22  ;;  %886 = vmatpush.msrb.mxu3 %v874_v47  ;;  %v970_v22 = vld [vmem:[%s1722_s9 + $0x38] sm:$0xff] }
  0x50   : > { %806 = vmatpush.msrb.mxu1 %v750_v24  ;;  %v968_v24 = vld [vmem:[%s1722_s9 + $0x28] sm:$0xff] }
  0x51   : > { %840 = vmatpush.msra.mxu2 %v818_v25  ;;  %887 = vmatpush.msrb.mxu3 %v873_v49  ;;  %v967_v25 = vld [vmem:[%s1722_s9 + $0x20] sm:$0xff] }
  0x52   : > { %807 = vmatpush.msrb.mxu1 %v749_v27  ;;  %v965_v27 = vld [vmem:[%s1722_s9 + $0x10] sm:$0xff] }
  0x53   : > { %841 = vmatpush.msra.mxu2 %v817_v28  ;;  %888 = vmatpush.msrb.mxu3 %v872_v51  ;;  %v964_v28 = vld [vmem:[%s1722_s9 + $0x8] sm:$0xff] }
  0x54   : > { %808 = vmatpush.msrb.mxu1 %v748_v30 }
  0x55   : > { %842 = vmatpush.msra.mxu2 %v816_v31 }
  0xb9   : > { %v505_v53 = vpop.f32.mrf.mxu0 }
  0xbf   : > { %v528_v54 = vpop.f32.mrf.mxu3 }
  0xc0   : > { %v529_v55 = vadd.f32 %v528_v54, %v505_v53  ;;  %v558_v56 = vpop.f32.mrf.mxu2  ;;  %v871_v53 = vld [vmem:[#allocation13 + $0x60] sm:$0xff]  ;;  %v864_v54 = vld [vmem:[#allocation13 + $0x38] sm:$0xff] }
  0xc1   : > { %v620_v59 = vpop.f32.mrf.mxu0  ;;  %889 = vmatpush.msrb.mxu3 %v871_v53  ;;  %909 = vmatpush.msrb.mxu0 %v864_v54 }
  0xc2   : > { %v561_v57 = vadd.f32 %v558_v56, %v529_v55  ;;  %v927_v55 = vld [vmem:[#allocation13 + $0xa0] sm:$0xff]  ;;  %v870_v56 = vld [vmem:[#allocation13 + $0x58] sm:$0xff] }
  0xc3   : > { %890 = vmatpush.msrb.mxu3 %v870_v56 }
  0xc7   : > { %v589_v58 = vpop.f32.mrf.mxu3 }
  0xc8   : > { %v592_v60 = vadd.f32 %v589_v58, %v561_v57  ;;  %v863_v57 = vld [vmem:[#allocation13 + $0x30] sm:$0xff]  ;;  %v926_v58 = vld [vmem:[#allocation13 + $0x98] sm:$0xff] }
  0xc9   : > { %910 = vmatpush.msrb.mxu0 %v863_v57 }
  0xca   : > { %v623_v62 = vadd.f32 %v620_v59, %v592_v60  ;;  %v869_v59 = vld [vmem:[#allocation13 + $0x50] sm:$0xff]  ;;  %v862_v60 = vld [vmem:[#allocation13 + $0x28] sm:$0xff] }
  0xcb   : > { %891 = vmatpush.msrb.mxu3 %v869_v59  ;;  %911 = vmatpush.msrb.mxu0 %v862_v60 }
  0xcc   : > { %v624_v0 = vadd.f32 %v1219_v61, %v623_v62  ;;  %v925_v61 = vld [vmem:[#allocation13 + $0x90] sm:$0xff]  ;;  %v868_v62 = vld [vmem:[#allocation13 + $0x48] sm:$0xff] }
  0xcd   : > { %892 = vmatpush.msrb.mxu3 %v868_v62 }
  0xce   : > { %v625_v2 = vmax.f32 %v624_v0, 0.0  ;;  %v924_v0 = vld [vmem:[#allocation13 + $0x88] sm:$0xff] }
  0xd0   : > { %v626_v3 = vmul.f32 %v1220_v63, %v625_v2  ;;  %v861_v63 = vld [vmem:[#allocation13 + $0x20] sm:$0xff]  ;;  %v860_v2 = vld [vmem:[#allocation13 + $0x18] sm:$0xff] }
  0xd1   : > { %912 = vmatpush.msrb.mxu0 %v861_v63 }
  0xd2   : > { %v627_v4 = vadd.f32 %v1221_v1, %v626_v3  ;;  %v867_v1 = vld [vmem:[#allocation13 + $0x40] sm:$0xff] }
  0xd3   : > { %v923_v3 = vld [vmem:[#allocation13 + $0x80] sm:$0xff]  ;;  %893 = vmatpush.msrb.mxu3 %v867_v1  ;;  %913 = vmatpush.msrb.mxu0 %v860_v2 }
  0xd4   : > { %628 = vst.msk [vmem:[#allocation3 + $0x1] sm:$0xff] %vm451_vm2, %v627_v4  ;;  %v859_v4 = vld [vmem:[#allocation13 + $0x10] sm:$0xff] }
  0xd5   : > { %914 = vmatpush.msrb.mxu0 %v859_v4 }
  0xdb   : > { %v645_v5 = vld [vmem:[#allocation3 + $0x1] ss:$2 sm:$0xf]  ;;  %v635_v6 = vld [vmem:[#allocation3] ss:$2 sm:$0xf] }
  0xdc   : > { %1123 = vmatmul.msk.f32.vlgmr.msra.gmra.mxu1 %vm451_vm2, %v645_v5  ;;  %1124 = vmatmul.msk.f32.vlgmr.msrb.gmra.mxu2 %vm451_vm2, %v635_v6  ;;  %v702_v7 = vld [vmem:[#allocation3 + $0x2] ss:$2 sm:$0xf] }
  0xdd   : > { %1125 = vmatmul.msk.f32.vlgmr.msra.gmra.mxu3 %vm451_vm2, %v702_v7  ;;  %942 = vmatpush.msra.mxu1 %v930_v48  ;;  %v858_v5 = vld [vmem:[#allocation13 + $0x8] sm:$0xff]  ;;  %v857_v6 = vld [vmem:[#allocation13] sm:$0xff]  ;;  %v856_v7 = vld [vmem:[#allocation5] sm:$0x1] }
  0xde   : > { %915 = vmatpush.msrb.mxu0 %v858_v5  ;;  %983 = vmatpush.msrb.mxu2 %v970_v22 }
  0xdf   : > { %943 = vmatpush.msra.mxu1 %v929_v50 }
  0xe0   : > { %916 = vmatpush.msrb.mxu0 %v857_v6  ;;  %984 = vmatpush.msrb.mxu2 %v969_v23 }
  0xe1   : > { %944 = vmatpush.msra.mxu1 %v928_v52 }
  0xe2   : > { %985 = vmatpush.msrb.mxu2 %v968_v24 }
  0xe3   : > { %945 = vmatpush.msra.mxu1 %v927_v55 }
  0xe4   : > { %986 = vmatpush.msrb.mxu2 %v967_v25 }
  0xe5   : > { %946 = vmatpush.msra.mxu1 %v926_v58 }
  0xe6   : > { %987 = vmatpush.msrb.mxu2 %v966_v26 }
  0xe7   : > { %947 = vmatpush.msra.mxu1 %v925_v61 }
  0xe8   : > { %988 = vmatpush.msrb.mxu2 %v965_v27 }
  0xe9   : > { %948 = vmatpush.msra.mxu1 %v924_v0 }
  0xea   : > { %989 = vmatpush.msrb.mxu2 %v964_v28 }
  0xeb   : > { %949 = vmatpush.msra.mxu1 %v923_v3 }
  0xec   : > { %990 = vmatpush.msrb.mxu2 %v963_v29 }
 0x159   : > { %v675_v32 = vpop.f32.mrf.mxu1 }
 0x15f   : > { %v698_v33 = vpop.f32.mrf.mxu2 }
 0x160   : > { %v699_v34 = vadd.f32 %v698_v33, %v675_v32  ;;  %v732_v36 = vpop.f32.mrf.mxu3 }
 0x162   : > { %v735_v37 = vadd.f32 %v732_v36, %v699_v34  ;;  %v853_v34 = vld [vmem:[%s1721_s8] sm:$0x1] }
 0x164   : > { %v736_v39 = vadd.f32 %v1222_v35, %v735_v37  ;;  %v854_v37 = vld [vmem:[%s1721_s8 + $0x1] sm:$0x1] }
 0x166   : > { %v737_v41 = vmax.f32 %v736_v39, 0.0  ;;  %v855_v39 = vld [vmem:[%s1721_s8 + $0x2] sm:$0x1] }
 0x168   : > { %v738_v42 = vmul.f32 %v1223_v38, %v737_v41 }
 0x16a   : > { %v739_v43 = vadd.f32 %v1224_v40, %v738_v42 }
 0x16c   : > { %740 = vst.msk [vmem:[#allocation4 + $0x1] sm:$0xf] %vm457_vm5, %v739_v43  ;;  %v971_v43 = vld [vmem:[%s1723_s10] sm:$0x1] }
 0x173   : > { %v757_v44 = vld [vmem:[#allocation4 + $0x1] ss:$2 sm:$0x3]  ;;  %v747_v45 = vld [vmem:[#allocation4] ss:$2 sm:$0x3] }
 0x174   : > { %1126 = vmatmul.msk.f32.vlgmr.msra.gmra.mxu0 %vm451_vm2, %v757_v44  ;;  %1127 = vmatmul.msk.f32.vlgmr.msrb.gmra.mxu1 %vm451_vm2, %v747_v45  ;;  %v814_v46 = vld [vmem:[#allocation4 + $0x2] ss:$2 sm:$0x3] }
 0x175   : > { %1128 = vmatmul.msk.f32.vlgmr.msra.gmra.mxu2 %vm451_vm2, %v814_v46 }
 0x17c   : > { %1130 = vmatmul.msk.f32.vlgmr.msrb.gmra.mxu0 %vm451_vm2, %v856_v7 }
 0x1f1   : > { %v787_v8 = vpop.f32.mrf.mxu0  ;;  %v810_v9 = vpop.f32.mrf.mxu1 }
 0x1f2   : > { %v811_v10 = vadd.f32 %v810_v9, %v787_v8 }
 0x1f8   : > { %v844_v12 = vpop.f32.mrf.mxu2 }
 0x1f9   : > { %v847_v13 = vadd.f32 %v844_v12, %v811_v10  ;;  %v918_v30 = vpop.f32.mrf.mxu0 }
 0x1fb   : > { %v848_v15 = vadd.f32 %v1225_v11, %v847_v13 }
 0x1fd   : > { %v849_v17 = vmax.f32 %v848_v15, 0.0 }
 0x1ff   : > { %v850_v18 = vmul.f32 %v1226_v14, %v849_v17 }
 0x201   : > { %v851_v19 = vadd.f32 %v1227_v16, %v850_v18 }
 0x203   : > { %852 = vst.msk [vmem:[#allocation5 + $0x1] sm:$0x3] %vm453_vm3, %v851_v19 }
 0x20a   : > { %v865_v20 = vld [vmem:[#allocation5 + $0x1] sm:$0x1]  ;;  %v921_v21 = vld [vmem:[#allocation5 + $0x2] sm:$0x1] }
 0x20b   : > { %1129 = vmatmul.msk.f32.vlgmr.msrb.gmra.mxu3 %vm451_vm2, %v865_v20  ;;  %1131 = vmatmul.msk.f32.vlgmr.msra.gmra.mxu1 %vm451_vm2, %v921_v21 }
 0x288   : > { %v951_v33 = vpop.f32.mrf.mxu1 }
 0x28e   : > { %v895_v31 = vpop.f32.mrf.mxu3 }
 0x28f   : > { %v919_v32 = vadd.f32 %v918_v30, %v895_v31 }
 0x291   : > { %v954_v35 = vadd.f32 %v951_v33, %v919_v32 }
 0x293   : > { %v955_v36 = vadd.f32 %v954_v35, %v853_v34 }
 0x295   : > { %v956_v38 = vmax.f32 %v955_v36, 0.0 }
 0x297   : > { %v957_v40 = vmul.f32 %v956_v38, %v854_v37 }
 0x299   : > { %v958_v41 = vadd.f32 %v957_v40, %v855_v39 }
 0x29b   : > { %961 = vst.msk [vmem:[#allocation6] sm:$0x1] %vm960_vm6, %v958_v41 }
 0x2a2   : > { %v962_v42 = vld [vmem:[#allocation6] sm:$0x1] }
 0x2a3   : > { %1132 = vmatmul.msk.f32.vlgmr.msrb.gmra.mxu2 %vm451_vm2, %v962_v42 }
 0x326   : > { %v992_v44 = vpop.f32.mrf.mxu2 }
 0x327   : > { %v993_v45 = vadd.f32 %v992_v44, %v971_v43 }
 0x329   : > { %995 = vst [vmem:[%s445_s1] sm:$0x1] %v993_v45 }
 0x32a   : > { %1375 = shalt.err (!%p1372_p8)
}
 0x32b   : > { %1152 = dma.vmem_to_hbm [thread:$0]  (%p1529_p5), %s1008_s17, 16, %s1010_s19, %s997_s23  }
 0x32c PF: > { %s1743_s30 = sld [smem:[#allocation20_spill]]  ;;  %p1179_p9 = scmp.ge.s32.totalorder %s1422_s20, 2 }
 0x32e   : > { %p1168_p10 = pnand %p1179_p9, %p1533_p6 }
 0x330   : > { %p1169_p11 = pneg %p1168_p10 }
 0x332   : > { %s1021_s14 = sand.u32 1, %s1743_s30  }
 0x333   : > { %s1022_s15 = scalar_lea.sflag [#allocation9], %s1021_s14 }
 0x334   : > { %1405 = dma.done.wait (%p1169_p11), %s1022_s15, 16  }
 0x335   : > { %1407 = vsyncadd (%p1169_p11), %s1022_s15, 4294967280  ;;  %s1745_s20 = sld [smem:[#allocation22_spill]]  ;;  %s1748_s17 = smov %s1414_s18 }
 0x336   : > { %s1746_s24 = sld [smem:[#allocation21_spill]] }
 0x337   : > { %s1747_s19 = sld [smem:[#allocation23_spill]] }
 0x33b   : > { %p24_p12 = scmp.ge.s32.totalorder %s1745_s20, 4  }
 0x33c   : > { %s1749_s18 = smov %s1746_s24 }
 0x33d   :  { %26 = sbr.rel (!%p24_p12) target bundleno = 9 (0x9), region = 134 }
 0x342   :  { %1027 = vsyncpa [#allocation8], 1 }
 0x343   :  { %1029 = vsyncpa [#allocation8 + $0x1], 1 }
 0x344   :  { %1030 = vsyncpa [#allocation11], 1 }
 0x345   :  { %1031 = vsyncpa [#allocation14], 1 }
 0x346   :  { %1032 = vsyncpa [#allocation9], 1 }
 0x347   :  { %1034 = vsyncpa [#allocation9 + $0x1], 1 }

</bundles_post_ra>
